<compile_context>
chip_gen: v7x
topology: tpu7x:2x2x1
jax: 0.10.0
libtpu: 0.0.40
codegen_flags: <defaults>
</compile_context>

<pallas_src>
import jax
import jax.numpy as jnp
from jax.experimental import pallas as pl
from jax.experimental.pallas import tpu as pltpu

LANES = 128
TARGET_BLOCK_BYTES = 2 * 1024 * 1024  # ~2 MiB per block (in+out double-buffered ~8 MiB)


def _cdiv(a, b):
    return -(-a // b)


def _round_up(a, m):
    return _cdiv(a, m) * m


def _thresholds(bit, all_positive, symmetric):
    """Mirrors LSQ.__init__ threshold selection."""
    if all_positive:
        if bit == 1:
            return 0, 1
        if symmetric:
            return 0, 2 ** bit - 2
        return 0, 2 ** bit - 1
    if bit == 1:
        return -1, 1
    if symmetric:
        return -2 ** (bit - 1) + 1, 2 ** (bit - 1) - 1
    return -2 ** (bit - 1), 2 ** (bit - 1) - 1


def _sublane(dtype):
    """Sublane granularity for packed dtypes: f32 -> 8, bf16 -> 16, int8 -> 32."""
    itemsize = jnp.dtype(dtype).itemsize
    return max(8, 32 // max(itemsize, 1))


def _num_tensorcores():
    """Best-effort TensorCore count behind one JAX device (for grid balance)."""
    try:
        kind = str(getattr(jax.devices()[0], "device_kind", "")).lower()
        if "v7" in kind or "v4" in kind or "v5p" in kind:
            return 2
    except Exception:
        pass
    return 1


def _choose_tile_rows(rows, dtype, num_cores):
    """Fixed large tile (~TARGET_BLOCK_BYTES); ragged last block handled by Pallas.

    - Small arrays on 1-TC chips: single full-extent block (no step overhead).
    - Small arrays on 2-TC chips: split into 2 blocks so both cores stream.
    - Large arrays: max-size tile; on 2-TC chips nudge the tile down so the
      grid length is even and both cores get equal work.
    """
    sub = _sublane(dtype)
    itemsize = jnp.dtype(dtype).itemsize
    max_tile = max(sub, (TARGET_BLOCK_BYTES // (LANES * itemsize)) // sub * sub)

    if rows <= max_tile:
        if num_cores >= 2 and rows >= 2 * sub:
            return _round_up(_cdiv(rows, 2), sub)   # grid of 2 (last block may be ragged)
        return rows                                  # single full-extent block

    tile = max_tile
    if num_cores >= 2:
        g = _cdiv(rows, tile)
        if g % 2:                                    # keep the parallel grid even
            tile = _round_up(_cdiv(rows, g + 1), sub)
    return tile


def _make_lsq_kernel(eps, thd_neg, thd_pos, sign_mode):
    """Elementwise fake-quant kernel. s lives in SMEM (scalar), x/o in VMEM tiles."""

    def kernel(s_ref, x_ref, o_ref):
        # --- scalar path (SMEM/sregs): one clip + one exact reciprocal per block ---
        s = s_ref[0, 0]
        s_scale = jnp.where(s > eps, s, eps)       # clip() forward value (> 0)
        inv_s = 1.0 / s_scale                      # exact scalar reciprocal
        # --- vector path: broadcast multiply + clip + round + multiply ---
        x = x_ref[...].astype(jnp.float32)
        if sign_mode:                              # bit==1 and not all_positive
            # sign(x / s_scale) == sign(x) because s_scale > 0: skip the divide.
            xq = jnp.sign(x)
        else:
            xq = jnp.round(jnp.clip(x * inv_s, thd_neg, thd_pos))
        o_ref[...] = (xq * s_scale).astype(o_ref.dtype)

    return kernel


def lsq_forward(x, s, *, bit=4, all_positive=False, symmetric=False, eps=1e-5):
    """Pallas implementation of LSQ.forward (forward values only).

    Note: x must be floating point. Compute is done in f32 and the result is
    cast back to x.dtype (for bf16/fp16 inputs this differs from the pure-JAX
    reference only by the final cast).
    """
    if not jnp.issubdtype(jnp.dtype(x.dtype), jnp.floating):
        raise TypeError("lsq_forward expects a floating-point input dtype")

    thd_neg, thd_pos = _thresholds(bit, all_positive, symmetric)
    sign_mode = (bit == 1) and (not all_positive)

    orig_shape = x.shape
    total = x.size
    rows = _cdiv(total, LANES)
    padded_total = rows * LANES                    # pad at most LANES-1 elements

    flat = x.reshape(-1)
    if padded_total != total:
        flat = jnp.pad(flat, (0, padded_total - total))
    x2d = flat.reshape(rows, LANES)

    num_cores = _num_tensorcores()
    tile_rows = _choose_tile_rows(rows, x.dtype, num_cores)
    grid = (_cdiv(rows, tile_rows),)

    s_smem = jnp.asarray(s, dtype=jnp.float32).reshape(1, 1)   # scalar step size -> SMEM
    kernel = _make_lsq_kernel(float(eps), float(thd_neg), float(thd_pos), sign_mode)
    itemsize = jnp.dtype(x.dtype).itemsize

    out2d = pl.pallas_call(
        kernel,
        out_shape=jax.ShapeDtypeStruct((rows, LANES), x.dtype),
        grid=grid,
        in_specs=[
            pl.BlockSpec(memory_space=pltpu.MemorySpace.SMEM),     # s (whole, scalar)
            pl.BlockSpec((tile_rows, LANES), lambda i: (i, 0)),    # x tile
        ],
        out_specs=pl.BlockSpec((tile_rows, LANES), lambda i: (i, 0)),
        compiler_params=pltpu.CompilerParams(dimension_semantics=("parallel",)),
        cost_estimate=pl.CostEstimate(
            flops=6 * padded_total,
            transcendentals=0,
            bytes_accessed=2 * padded_total * itemsize,
        ),
    )(s_smem, x2d)

    out_flat = out2d.reshape(-1)
    if padded_total != total:
        out_flat = out_flat[:total]
    return out_flat.reshape(orig_shape)


def lsq_reference(x, s, *, bit=4, all_positive=False, symmetric=False, eps=1e-5):
    """Pure-JAX reference of the forward values (for correctness check)."""
    thd_neg, thd_pos = _thresholds(bit, all_positive, symmetric)
    s_scale = jnp.where(s > eps, s, eps)   # shape (1,), broadcasts like PyTorch
    xs = x / s_scale
    if bit == 1 and not all_positive:
        xq = jnp.sign(xs)
    else:
        xq = jnp.round(jnp.clip(xs, thd_neg, thd_pos))
    return xq * s_scale


if __name__ == "__main__":
    key = jax.random.PRNGKey(0)
    # NCHW, like the PyTorch conv activations
    B, C, H, W = 2, 4, 16, 16
    x = jax.random.normal(key, (B, C, H, W), dtype=jnp.float32) * 0.5

    # Parameter from LSQ.__init__: s = ones(1)  (deterministic, no checkpoint)
    s = jnp.ones((1,), dtype=jnp.float32)

    # default config: bit=4, all_positive=False, symmetric=False
    out = jax.block_until_ready(lsq_forward(x, s, bit=4))
    ref = lsq_reference(x, s, bit=4)
    assert out.shape == x.shape and out.dtype == x.dtype
    assert jnp.allclose(out, ref, atol=1e-6, rtol=1e-6), "bit=4 mismatch vs reference"

    # 1-bit sign path
    out1 = jax.block_until_ready(lsq_forward(x, s, bit=1))
    ref1 = lsq_reference(x, s, bit=1)
    assert jnp.allclose(out1, ref1, atol=1e-6, rtol=1e-6), "bit=1 mismatch vs reference"

    # shape whose flattened size is NOT a multiple of 128 (exercises the
    # minimal-padding path: pad < 128 elements, never to a tile multiple)
    x_odd = jax.random.normal(jax.random.PRNGKey(1), (2, 4, 15, 15), dtype=jnp.float32)
    out_odd = jax.block_until_ready(lsq_forward(x_odd, s, bit=4))
    ref_odd = lsq_reference(x_odd, s, bit=4)
    assert out_odd.shape == x_odd.shape
    assert jnp.allclose(out_odd, ref_odd, atol=1e-6, rtol=1e-6), "padded-shape mismatch"

    # medium shape that produces a multi-block grid with a ragged last block
    x_big = jax.random.normal(jax.random.PRNGKey(2), (4, 64, 48, 48), dtype=jnp.float32)
    out_big = jax.block_until_ready(lsq_forward(x_big, s, bit=4))
    ref_big = lsq_reference(x_big, s, bit=4)
    assert out_big.shape == x_big.shape
    assert jnp.allclose(out_big, ref_big, atol=1e-6, rtol=1e-6), "ragged-grid mismatch"

    print("KERNEL_OK")
</pallas_src>

<mosaic_0001>
module attributes {stable_mosaic.version = 11 : i64} {
  func.func @kernel(%arg0: i32, %arg1: memref<1x1xf32, #tpu.memory_space<smem>>, %arg2: memref<16x128xf32, #tpu.memory_space<vmem>>, %arg3: memref<16x128xf32, #tpu.memory_space<vmem>>) attributes {dimension_semantics = [#tpu.dimension_semantics<parallel>], iteration_bounds = array<i64: 1>, scalar_prefetch = 0 : i64, scratch_operands = 0 : i64, tpu.core_type = #tpu.core_type<tc>, window_params = [{transform_indices = @transform_0, window_bounds = array<i64: 1, 1>}, {transform_indices = @transform_1, window_bounds = array<i64: 16, 128>}, {transform_indices = @transform_2, window_bounds = array<i64: 16, 128>}]} {
    %c0 = arith.constant 0 : index
    %c0_0 = arith.constant 0 : index
    %0 = memref.load %arg1[%c0, %c0_0] : memref<1x1xf32, #tpu.memory_space<smem>>
    %cst = arith.constant 9.99999974E-6 : f32
    %1 = arith.cmpf ogt, %0, %cst : f32
    %cst_1 = arith.constant 9.99999974E-6 : f32
    %2 = arith.select %1, %0, %cst_1 : f32
    %cst_2 = arith.constant 1.000000e+00 : f32
    %3 = arith.divf %cst_2, %2 : f32
    %c0_3 = arith.constant 0 : index
    %c0_4 = arith.constant 0 : index
    %4 = vector.load %arg2[%c0_3, %c0_4] : memref<16x128xf32, #tpu.memory_space<vmem>>, vector<16x128xf32>
    %5 = vector.broadcast %3 : f32 to vector<16x128xf32>
    %6 = arith.mulf %4, %5 : vector<16x128xf32>
    %cst_5 = arith.constant -8.000000e+00 : f32
    %cst_6 = arith.constant 7.000000e+00 : f32
    %7 = vector.broadcast %cst_5 : f32 to vector<16x128xf32>
    %8 = arith.maximumf %7, %6 : vector<16x128xf32>
    %9 = vector.broadcast %cst_6 : f32 to vector<16x128xf32>
    %10 = arith.minimumf %9, %8 : vector<16x128xf32>
    %11 = math.roundeven %10 : vector<16x128xf32>
    %12 = vector.broadcast %2 : f32 to vector<16x128xf32>
    %13 = arith.mulf %11, %12 : vector<16x128xf32>
    %c0_7 = arith.constant 0 : index
    %c0_8 = arith.constant 0 : index
    %14 = vector.load %arg3[%c0_7, %c0_8] : memref<16x128xf32, #tpu.memory_space<vmem>>, vector<16x128xf32>
    tpu.vector_store %arg3[%c0_7, %c0_8], %13 {strides = array<i32>} : memref<16x128xf32, #tpu.memory_space<vmem>>, vector<16x128xf32>,
    return
  }
  func.func @transform_0(%arg0: i32) -> (i32, i32) {
    %c0_i32 = arith.constant 0 : i32
    %c0_i32_0 = arith.constant 0 : i32
    %c0_i32_1 = arith.constant 0 : i32
    return %c0_i32, %c0_i32_0 : i32, i32
  }
  func.func @transform_1(%arg0: i32) -> (i32, i32) {
    %c0_i32 = arith.constant 0 : i32
    %c0_i32_0 = arith.constant 0 : i32
    return %arg0, %c0_i32 : i32, i32
  }
  func.func @transform_2(%arg0: i32) -> (i32, i32) {
    %c0_i32 = arith.constant 0 : i32
    %c0_i32_0 = arith.constant 0 : i32
    return %arg0, %c0_i32 : i32, i32
  }
}

</mosaic_0001>

<bundles_post_ra>
// kernel: tpu_custom_call.1
= control target key start
LH: loop header
LB: loop body
LE: loop exit
PB: predicated region body
PF: predicated region fallthrough
CT: control target
= control target key end

     0   :  { %8 = vsyncpa [#allocation4], 0  ;;  %s179_s0 = inlined_call_operand.<no memory space> [shape: f32[1,1], index: 0, kind: input, shape index: {}]   ;;  %s180_s1 = inlined_call_operand.hbm [shape: f32[16,128], index: 1, kind: input, shape index: {}]   ;;  %s181_s2 = inlined_call_operand.hbm [shape: f32[16,128], index: 2, kind: output, shape index: {}]  }
   0x1   :  { %9 = vsyncpa [#allocation5], 0  ;;  %s124_s9 = smov [#allocation3]   ;;  %s76_s13 = scalar_lea.hbm %s180_s1, 256 }
   0x2   :  { %s17_s10 = sshll.u32 %s124_s9, 4  ;;  %p77_p0 = scmp.ne.s32.totalorder %s180_s1, %s76_s13  ;;  %s18_s10 = int_to_ptr.vmem [resolvable:$true] %s17_s10 }
   0x3   :  { %p80_p1 = scmp.lt.u32.totalorder %s76_s13, %s180_s1 }
   0x5   :  { %p82_p2 = pnand %p80_p1, %p77_p0 }
   0x7   :  { %85 = shalt.err (!%p82_p2)
}
   0x8   :  { %s86_s18 = scalar_lea.vmem %s18_s10, 256  ;;  %p91_p4 = scmp.lt.s32.totalorder %s18_s10, %s18_s10 }
   0x9   :  { %p87_p3 = scmp.ne.s32.totalorder %s18_s10, %s86_s18  ;;  %p92_p5 = scmp.lt.s32.totalorder %s86_s18, %s86_s18 }
   0xb   :  { %p93_p6 = por %p92_p5, %p91_p4 }
   0xd   :  { %p94_p7 = pnand %p93_p6, %p87_p3 }
   0xf   :  { %97 = shalt.err (!%p94_p7)
}
  0x10   :  { %s125_s19 = smov 128   ;;  %s126_s20 = smov 8  }
  0x11   :  { %23 = dma.hbm_to_vmem [thread:$0]  %s180_s1, 256, %s18_s10, [#allocation4], %s125_s19, %s125_s19, %s126_s20  }
  0x12   :  { %p28_p8 = scmp.gt.f32.partialorder %s179_s0, 1e-05 }
  0x13   :  { %120 = dma.done.wait [#allocation4], 256  }
  0x14   :  { %121 = vsyncadd [#allocation4], 4294967040  ;;  %s183_s0 = smov (!%p28_p8, %s179_s0), 1e-05  ;;  %v33_v2 = vld [vmem:[#allocation3] sm:$0xff]  ;;  %v34_v3 = vld [vmem:[#allocation3 + $0x8] sm:$0xff] }
  0x15   :  { %v30_v0 = vstv %s183_s0  ;;  %s127_s1 = smov [#allocation6]  }
  0x16   :  { %74 = vrcp.f32 %v30_v0  ;;  %s54_s28 = sshll.u32 %s127_s1, 4  ;;  %s55_s28 = int_to_ptr.vmem [resolvable:$true] %s54_s28 }
  0x17   :  { %s98_s0 = scalar_lea.vmem %s55_s28, 256  ;;  %p103_p10 = scmp.lt.s32.totalorder %s55_s28, %s55_s28 }
  0x18   :  { %p99_p9 = scmp.ne.s32.totalorder %s55_s28, %s98_s0  ;;  %p104_p11 = scmp.lt.s32.totalorder %s98_s0, %s98_s0 }
  0x1a   :  { %p105_p12 = por %p104_p11, %p103_p10 }
  0x1c   :  { %p106_p13 = pnand %p105_p12, %p99_p9 }
  0x20   :  { %v75_v1 = vpop.eup %74 }
  0x21   :  { %66 = vpush %v75_v1 }
  0x52   :  { %s67_s27 = spop %66 }
  0x53   :  { %v35_v4 = vstv %s67_s27 }
  0x54   :  { %v36_v5 = vmul.f32 %v35_v4, %v33_v2  ;;  %v37_v6 = vmul.f32 %v35_v4, %v34_v3 }
  0x56   :  { %v38_v7 = vmax.f32 %v36_v5, -8.0  ;;  %v39_v8 = vmax.f32 %v37_v6, -8.0 }
  0x58   :  { %v40_v9 = vmin.f32 %v38_v7, 7.0  ;;  %v41_v10 = vmin.f32 %v39_v8, 7.0 }
  0x5a   :  { %v68_v11 = vround.rtne.f32 %v40_v9  ;;  %v69_v12 = vround.rtne.f32 %v41_v10 }
  0x5c   :  { %v45_v13 = vmul.f32 %v68_v11, %v30_v0  ;;  %v46_v14 = vmul.f32 %v69_v12, %v30_v0 }
  0x5e   :  { %47 = vst [vmem:[#allocation6] sm:$0xff] %v45_v13  ;;  %48 = vst [vmem:[#allocation6 + $0x8] sm:$0xff] %v46_v14 }
  0x5f   :  { %109 = shalt.err (!%p106_p13)
}
  0x60   :  { %s110_s3 = scalar_lea.hbm %s181_s2, 256 }
  0x61   :  { %p111_p0 = scmp.ne.s32.totalorder %s181_s2, %s110_s3  ;;  %p114_p1 = scmp.lt.u32.totalorder %s110_s3, %s181_s2 }
  0x63   :  { %p116_p2 = pnand %p114_p1, %p111_p0 }
  0x65   :  { %119 = shalt.err (!%p116_p2)
}
  0x66   :  { %60 = dma.vmem_to_hbm [thread:$0]  %s55_s28, 256, %s181_s2, [#allocation5], %s125_s19, %s125_s19, %s126_s20  }
  0x67   :  { %122 = dma.done.wait [#allocation5], 256  }
  0x68   :  { %123 = vsyncadd [#allocation5], 4294967040 }
  0x69   :  { %64 = vsyncpa [#allocation4], 1 }
  0x6a   :  { %65 = vsyncpa [#allocation5], 1 }

</bundles_post_ra>
